<compile_context>
chip_gen: v5e
topology: v5e:2x2
jax: 0.10.0
libtpu: 0.0.40
codegen_flags: <defaults>
</compile_context>

<pallas_src>
import functools
import math

import jax
import jax.numpy as jnp
from jax.experimental import pallas as pl
from jax.experimental.pallas import tpu as pltpu


def _round_up(x, m):
    return ((x + m - 1) // m) * m


def _neuromod_hidden_sum_kernel(x_ref, w1_ref, b1_ref, out_ref, acc_ref, *,
                                n_valid, chunk):
    """Accumulate sum_n relu(w1 * x_n + b1) over this slice's lane-tiles.

    Grid: (P, bpp); axis 0 "parallel" (TensorCore split), axis 1 "arbitrary".
    x_ref  : (1, TN)   lane-dense slice of the flattened activity
    w1_ref : (H, 1)    Linear(1->H) weight (PyTorch layout)
    b1_ref : (H, 1)
    out_ref: (1, H, 1) per-slice partial sum (resident across axis 1)
    acc_ref: (H, 1)    f32 VMEM accumulator
    """
    p = pl.program_id(0)
    j = pl.program_id(1)
    bpp = pl.num_programs(1)
    tn = x_ref.shape[-1]
    h_dim = w1_ref.shape[0]
    n_chunks = tn // chunk
    unroll = min(8, n_chunks)

    @pl.when(j == 0)
    def _init():
        acc_ref[...] = jnp.zeros_like(acc_ref)

    w1 = w1_ref[...]                      # (H, 1)
    b1 = b1_ref[...]                      # (H, 1)

    blk = p * bpp + j                     # nominal global lane-tile index
    blk_start = blk * tn
    # Tile classification (scalar conditions -> pl.when, so full tiles never
    # pay any masking work):
    #   full    : all tn lanes are real data
    #   ragged  : straddles n_valid -> mask garbage lanes of the DMA'd block
    #   phantom : entirely past n_valid (parallel-split padding) -> skip
    is_full = (blk_start + tn) <= n_valid
    is_ragged = jnp.logical_and(blk_start < n_valid, jnp.logical_not(is_full))

    def block_sum(masked):
        lane = jax.lax.broadcasted_iota(jnp.int32, (1, chunk), 1)

        def body(c, acc):
            start = pl.multiple_of(c * chunk, chunk)
            xc = x_ref[:, pl.ds(start, chunk)]          # (1, chunk)
            xc = xc.astype(jnp.float32)
            if masked:
                # Select (not multiply) so NaN/Inf garbage lanes cannot
                # propagate; zeroed lanes contribute relu(b1), which the
                # wrapper subtracts exactly.
                limit = n_valid - blk_start - c * chunk
                xc = jnp.where(lane < limit, xc, 0.0)
            # VPU broadcast FMA + ReLU, accumulated elementwise; the single
            # cross-lane (XLU) reduce happens once per lane-tile, below.
            return acc + jnp.maximum(w1 * xc + b1, 0.0)  # (H, chunk)

        acc0 = jnp.zeros((h_dim, chunk), jnp.float32)
        acc = jax.lax.fori_loop(0, n_chunks, body, acc0, unroll=unroll)
        return jnp.sum(acc, axis=-1, keepdims=True)      # (H, 1)

    @pl.when(is_full)
    def _full():
        acc_ref[...] += block_sum(masked=False)

    @pl.when(is_ragged)
    def _ragged():
        acc_ref[...] += block_sum(masked=True)

    @pl.when(j == bpp - 1)
    def _write():
        out_ref[0, :, :] = acc_ref[...]


def neuromodulation_gate(global_activity, w1, b1, w2, b2, *,
                         lane_tile=256 * 1024):
    """mean_N( relu(x @ w1.T + b1) @ w2 + b2 ) over the flattened activity.

    w1: (H, 1), b1: (H,), w2: (H, D) (== torch Linear(H, D).weight.T), b2: (D,)
    """
    x_flat = jnp.reshape(global_activity, (-1,))
    if not jnp.issubdtype(x_flat.dtype, jnp.floating):
        x_flat = x_flat.astype(jnp.float32)   # torch .float(); floats are cast
    n = int(x_flat.shape[0])                  # per-chunk inside the kernel.
    h_dim = int(w1.shape[0])
    d = int(w2.shape[1])

    # Inner sub-chunk width: keep the live (H, chunk) f32 loop carry ~16 vregs.
    chunk = max(128, min(1024, ((16 * 1024) // max(h_dim, 1)) // 128 * 128))
    lane_tile = max(chunk, (int(lane_tile) // chunk) * chunk)

    if n >= lane_tile:
        tn = lane_tile
        x2d = x_flat.reshape(1, n)            # no pad -> no extra HBM pass
    else:
        tn = _round_up(max(n, 1), chunk)      # tiny input: cheap pad to 1 tile
        pad = tn - n
        x2d = (jnp.pad(x_flat, (0, pad)) if pad else x_flat).reshape(1, tn)

    x_len = int(x2d.shape[1])
    nbt = pl.cdiv(x_len, tn)                  # real lane-tiles covering data
    num_slices = 2 if nbt >= 2 else 1         # v7x: one slice per TensorCore
    bpp = pl.cdiv(nbt, num_slices)            # sequential tiles per slice

    w1c = w1.astype(jnp.float32).reshape(h_dim, 1)
    b1c = jnp.reshape(b1, (h_dim, 1)).astype(jnp.float32)

    kernel = functools.partial(_neuromod_hidden_sum_kernel,
                               n_valid=n, chunk=chunk)

    def x_index_map(p, j):
        blk = p * bpp + j
        return (0, jnp.minimum(blk, nbt - 1))   # clamp phantom tiles in-bounds

    x_itemsize = jnp.dtype(x2d.dtype).itemsize
    cost = pl.CostEstimate(
        flops=4 * h_dim * nbt * tn,
        transcendentals=0,
        bytes_accessed=x_len * x_itemsize + 4 * (2 * h_dim + num_slices * h_dim),
    )
    # (1, TN) blocks pad to 8 sublanes in VMEM: 2 buffers x 8 x 4B x TN.
    vmem_limit = int(min(96 * 2**20, max(32 * 2**20, 2 * 8 * 4 * tn + 16 * 2**20)))

    partial_sums = pl.pallas_call(
        kernel,
        out_shape=jax.ShapeDtypeStruct((num_slices, h_dim, 1), jnp.float32),
        grid_spec=pltpu.PrefetchScalarGridSpec(
            num_scalar_prefetch=0,
            grid=(num_slices, bpp),
            in_specs=[
                pl.BlockSpec((1, tn), x_index_map),            # activity tiles
                pl.BlockSpec((h_dim, 1), lambda p, j: (0, 0)),  # w1 (resident)
                pl.BlockSpec((h_dim, 1), lambda p, j: (0, 0)),  # b1 (resident)
            ],
            out_specs=pl.BlockSpec((1, h_dim, 1), lambda p, j: (p, 0, 0)),
            scratch_shapes=[pltpu.VMEM((h_dim, 1), jnp.float32)],
        ),
        compiler_params=pltpu.CompilerParams(
            dimension_semantics=("parallel", "arbitrary"),
            vmem_limit_bytes=vmem_limit,
        ),
        cost_estimate=cost,
    )(x2d, w1c, b1c)

    # Tiny epilogue (~1 KFLOP) in plain JAX: combine per-slice partials, remove
    # the exact relu(b1) contribution of masked/padded lanes, take the mean and
    # apply the second linear layer.
    h_sum = jnp.sum(partial_sums[:, :, 0], axis=0)       # (H,)
    invalid = nbt * tn - n                               # static lane count
    h_sum = h_sum - float(invalid) * jnp.maximum(b1c[:, 0], 0.0)
    h_mean = h_sum / float(n)
    return h_mean @ w2.astype(jnp.float32) + jnp.reshape(b2, (d,)).astype(jnp.float32)


def init_params(key, dim, hidden_dim):
    """nn.Linear-default init (uniform +-1/sqrt(fan_in)).

    w1: (H, 1) == PyTorch Linear(1, H).weight layout
    b1: (H,)
    w2: (H, D) == PyTorch Linear(H, D).weight.T  (stored in, out)
    b2: (D,)
    """
    k1, k2, k3, k4 = jax.random.split(key, 4)
    bnd1 = 1.0 / math.sqrt(1.0)
    w1 = jax.random.uniform(k1, (hidden_dim, 1), jnp.float32, -bnd1, bnd1)
    b1 = jax.random.uniform(k2, (hidden_dim,), jnp.float32, -bnd1, bnd1)
    bnd2 = 1.0 / math.sqrt(hidden_dim)
    w2 = jax.random.uniform(k3, (hidden_dim, dim), jnp.float32, -bnd2, bnd2)
    b2 = jax.random.uniform(k4, (dim,), jnp.float32, -bnd2, bnd2)
    return w1, b1, w2, b2


def _reference(global_activity, w1, b1, w2, b2):
    x = jnp.reshape(global_activity, (-1, 1)).astype(jnp.float32)
    h = jnp.maximum(x @ w1.T + b1, 0.0)      # (N, H)
    y = h @ w2 + b2                          # (N, D)
    return jnp.mean(y, axis=0)               # (D,)


if __name__ == "__main__":
    dim, hidden_dim = 32, 16
    key = jax.random.PRNGKey(0)
    k_param, k_in1, k_in2, k_in3 = jax.random.split(key, 4)

    w1, b1, w2, b2 = init_params(k_param, dim, hidden_dim)

    def _check(ga, **kw):
        out = jax.block_until_ready(neuromodulation_gate(ga, w1, b1, w2, b2, **kw))
        ref = _reference(ga, w1, b1, w2, b2)
        assert out.shape == (dim,)
        assert jnp.allclose(out, ref, atol=2e-5, rtol=2e-5), (
            float(jnp.max(jnp.abs(out - ref))))

    # Default path: (2, 4, 16, 16) -> N = 2048, single full lane-tile.
    _check(jax.random.normal(k_in1, (2, 4, 16, 16), dtype=jnp.float32))

    # Tiny / heavily padded path: N = 8 (exercises the ragged mask + correction).
    _check(jax.random.normal(k_in2, (2, 4), dtype=jnp.float32))

    # Multi-tile path with a small lane_tile override: N = 5000, tn = 1024 ->
    # 5 real tiles split over 2 parallel slices (one ragged, one phantom).
    _check(jax.random.normal(k_in3, (5000,), dtype=jnp.float32), lane_tile=1024)

    print("KERNEL_OK")
</pallas_src>

<mosaic_0001>
module attributes {stable_mosaic.version = 11 : i64} {
  func.func @_neuromod_hidden_sum_kernel(%arg0: i32, %arg1: i32, %arg2: memref<1x2048xf32, #tpu.memory_space<vmem>>, %arg3: memref<16x1xf32, #tpu.memory_space<vmem>>, %arg4: memref<16x1xf32, #tpu.memory_space<vmem>>, %arg5: memref<1x16x1xf32, #tpu.memory_space<vmem>>, %arg6: memref<16x1xf32, #tpu.memory_space<vmem>>) attributes {dimension_semantics = [#tpu.dimension_semantics<parallel>, #tpu.dimension_semantics<arbitrary>], iteration_bounds = array<i64: 1, 1>, scalar_prefetch = 0 : i64, scratch_operands = 1 : i64, tpu.core_type = #tpu.core_type<tc>, window_params = [{transform_indices = @transform_0, window_bounds = array<i64: 1, 2048>}, {pipeline_mode = #tpu.pipeline_mode<synchronous>, transform_indices = @transform_1, window_bounds = array<i64: 16, 1>}, {pipeline_mode = #tpu.pipeline_mode<synchronous>, transform_indices = @transform_2, window_bounds = array<i64: 16, 1>}, {transform_indices = @transform_3, window_bounds = array<i64: 1, 16, 1>}]} {
    %c0_i32 = arith.constant 0 : i32
    %0 = arith.cmpi eq, %arg1, %c0_i32 : i32
    %1 = arith.extui %0 : i1 to i32
    %c0_i32_0 = arith.constant 0 : i32
    %2 = arith.cmpi ne, %1, %c0_i32_0 : i32
    scf.if %2 {
      %cst = arith.constant 0.000000e+00 : f32
      %20 = vector.broadcast %cst : f32 to vector<16x1xf32>
      %c0_11 = arith.constant 0 : index
      %c0_12 = arith.constant 0 : index
      %21 = vector.load %arg6[%c0_11, %c0_12] : memref<16x1xf32, #tpu.memory_space<vmem>>, vector<16x1xf32>
      tpu.vector_store %arg6[%c0_11, %c0_12], %20 {strides = array<i32>} : memref<16x1xf32, #tpu.memory_space<vmem>>, vector<16x1xf32>,
    } else {
    }
    %c0 = arith.constant 0 : index
    %c0_1 = arith.constant 0 : index
    %3 = vector.load %arg3[%c0, %c0_1] : memref<16x1xf32, #tpu.memory_space<vmem>>, vector<16x1xf32>
    %c0_2 = arith.constant 0 : index
    %c0_3 = arith.constant 0 : index
    %4 = vector.load %arg4[%c0_2, %c0_3] : memref<16x1xf32, #tpu.memory_space<vmem>>, vector<16x1xf32>
    %c1_i32 = arith.constant 1 : i32
    %5 = arith.muli %arg0, %c1_i32 : i32
    %6 = arith.addi %5, %arg1 : i32
    %c2048_i32 = arith.constant 2048 : i32
    %7 = arith.muli %6, %c2048_i32 : i32
    %c2048_i32_4 = arith.constant 2048 : i32
    %8 = arith.addi %7, %c2048_i32_4 : i32
    %c2048_i32_5 = arith.constant 2048 : i32
    %9 = arith.cmpi sle, %8, %c2048_i32_5 : i32
    %c2048_i32_6 = arith.constant 2048 : i32
    %10 = arith.cmpi slt, %7, %c2048_i32_6 : i32
    %true = arith.constant true
    %11 = arith.xori %9, %true : i1
    %12 = arith.andi %10, %11 : i1
    %13 = arith.extui %9 : i1 to i32
    %c0_i32_7 = arith.constant 0 : i32
    %14 = arith.cmpi ne, %13, %c0_i32_7 : i32
    scf.if %14 {
      %c0_11 = arith.constant 0 : index
      %c0_12 = arith.constant 0 : index
      %20 = vector.load %arg6[%c0_11, %c0_12] : memref<16x1xf32, #tpu.memory_space<vmem>>, vector<16x1xf32>
      %cst = arith.constant 0.000000e+00 : f32
      %21 = vector.broadcast %cst : f32 to vector<16x1024xf32>
      %c0_i32_13 = arith.constant 0 : i32
      %c1024_i32 = arith.constant 1024 : i32
      %22 = arith.muli %c0_i32_13, %c1024_i32 : i32
      %23 = tpu.assume_multiple %22, 1024 : i32
      %c0_14 = arith.constant 0 : index
      %24 = arith.index_cast %23 : i32 to index
      %25 = vector.load %arg2[%c0_14, %24] : memref<1x2048xf32, #tpu.memory_space<vmem>>, vector<1x1024xf32>
      %26 = vector.broadcast %3 : vector<16x1xf32> to vector<16x1024xf32>
      %27 = vector.broadcast %25 : vector<1x1024xf32> to vector<16x1024xf32>
      %28 = arith.mulf %26, %27 : vector<16x1024xf32>
      %29 = vector.broadcast %4 : vector<16x1xf32> to vector<16x1024xf32>
      %30 = arith.addf %28, %29 : vector<16x1024xf32>
      %cst_15 = arith.constant 0.000000e+00 : f32
      %31 = vector.broadcast %cst_15 : f32 to vector<16x1024xf32>
      %32 = arith.maximumf %30, %31 : vector<16x1024xf32>
      %33 = arith.addf %21, %32 : vector<16x1024xf32>
      %c1_i32_16 = arith.constant 1 : i32
      %c1024_i32_17 = arith.constant 1024 : i32
      %34 = arith.muli %c1_i32_16, %c1024_i32_17 : i32
      %35 = tpu.assume_multiple %34, 1024 : i32
      %c0_18 = arith.constant 0 : index
      %36 = arith.index_cast %35 : i32 to index
      %37 = vector.load %arg2[%c0_18, %36] : memref<1x2048xf32, #tpu.memory_space<vmem>>, vector<1x1024xf32>
      %38 = vector.broadcast %3 : vector<16x1xf32> to vector<16x1024xf32>
      %39 = vector.broadcast %37 : vector<1x1024xf32> to vector<16x1024xf32>
      %40 = arith.mulf %38, %39 : vector<16x1024xf32>
      %41 = vector.broadcast %4 : vector<16x1xf32> to vector<16x1024xf32>
      %42 = arith.addf %40, %41 : vector<16x1024xf32>
      %cst_19 = arith.constant 0.000000e+00 : f32
      %43 = vector.broadcast %cst_19 : f32 to vector<16x1024xf32>
      %44 = arith.maximumf %42, %43 : vector<16x1024xf32>
      %45 = arith.addf %33, %44 : vector<16x1024xf32>
      %c2_i32 = arith.constant 2 : i32
      %cst_20 = arith.constant dense<0.000000e+00> : vector<16xf32>
      %46 = vector.multi_reduction <add>, %45, %cst_20 [1] : vector<16x1024xf32> to vector<16xf32>
      %47 = vector.shape_cast %46 : vector<16xf32> to vector<16x1xf32>
      %48 = arith.addf %20, %47 : vector<16x1xf32>
      %c0_21 = arith.constant 0 : index
      %c0_22 = arith.constant 0 : index
      %49 = vector.load %arg6[%c0_21, %c0_22] : memref<16x1xf32, #tpu.memory_space<vmem>>, vector<16x1xf32>
      tpu.vector_store %arg6[%c0_21, %c0_22], %48 {strides = array<i32>} : memref<16x1xf32, #tpu.memory_space<vmem>>, vector<16x1xf32>,
    } else {
    }
    %15 = arith.extui %12 : i1 to i32
    %c0_i32_8 = arith.constant 0 : i32
    %16 = arith.cmpi ne, %15, %c0_i32_8 : i32
    scf.if %16 {
      %c0_11 = arith.constant 0 : index
      %c0_12 = arith.constant 0 : index
      %20 = vector.load %arg6[%c0_11, %c0_12] : memref<16x1xf32, #tpu.memory_space<vmem>>, vector<16x1xf32>
      %21 = tpu.iota {dimensions = array<i32: 1>} : vector<1x1024xi32>
      %cst = arith.constant 0.000000e+00 : f32
      %22 = vector.broadcast %cst : f32 to vector<16x1024xf32>
      %c0_i32_13 = arith.constant 0 : i32
      %c1024_i32 = arith.constant 1024 : i32
      %23 = arith.muli %c0_i32_13, %c1024_i32 : i32
      %24 = tpu.assume_multiple %23, 1024 : i32
      %c0_14 = arith.constant 0 : index
      %25 = arith.index_cast %24 : i32 to index
      %26 = vector.load %arg2[%c0_14, %25] : memref<1x2048xf32, #tpu.memory_space<vmem>>, vector<1x1024xf32>
      %c2048_i32_15 = arith.constant 2048 : i32
      %27 = arith.subi %c2048_i32_15, %7 : i32
      %c1024_i32_16 = arith.constant 1024 : i32
      %28 = arith.muli %c0_i32_13, %c1024_i32_16 : i32
      %29 = arith.subi %27, %28 : i32
      %30 = vector.broadcast %29 : i32 to vector<1x1024xi32>
      %31 = arith.cmpi slt, %21, %30 : vector<1x1024xi32>
      %cst_17 = arith.constant 0.000000e+00 : f32
      %32 = vector.broadcast %cst_17 : f32 to vector<1x1024xf32>
      %33 = arith.select %31, %26, %32 : vector<1x1024xi1>, vector<1x1024xf32>
      %34 = vector.broadcast %3 : vector<16x1xf32> to vector<16x1024xf32>
      %35 = vector.broadcast %33 : vector<1x1024xf32> to vector<16x1024xf32>
      %36 = arith.mulf %34, %35 : vector<16x1024xf32>
      %37 = vector.broadcast %4 : vector<16x1xf32> to vector<16x1024xf32>
      %38 = arith.addf %36, %37 : vector<16x1024xf32>
      %cst_18 = arith.constant 0.000000e+00 : f32
      %39 = vector.broadcast %cst_18 : f32 to vector<16x1024xf32>
      %40 = arith.maximumf %38, %39 : vector<16x1024xf32>
      %41 = arith.addf %22, %40 : vector<16x1024xf32>
      %c1_i32_19 = arith.constant 1 : i32
      %c1024_i32_20 = arith.constant 1024 : i32
      %42 = arith.muli %c1_i32_19, %c1024_i32_20 : i32
      %43 = tpu.assume_multiple %42, 1024 : i32
      %c0_21 = arith.constant 0 : index
      %44 = arith.index_cast %43 : i32 to index
      %45 = vector.load %arg2[%c0_21, %44] : memref<1x2048xf32, #tpu.memory_space<vmem>>, vector<1x1024xf32>
      %c2048_i32_22 = arith.constant 2048 : i32
      %46 = arith.subi %c2048_i32_22, %7 : i32
      %c1024_i32_23 = arith.constant 1024 : i32
      %47 = arith.muli %c1_i32_19, %c1024_i32_23 : i32
      %48 = arith.subi %46, %47 : i32
      %49 = vector.broadcast %48 : i32 to vector<1x1024xi32>
      %50 = arith.cmpi slt, %21, %49 : vector<1x1024xi32>
      %cst_24 = arith.constant 0.000000e+00 : f32
      %51 = vector.broadcast %cst_24 : f32 to vector<1x1024xf32>
      %52 = arith.select %50, %45, %51 : vector<1x1024xi1>, vector<1x1024xf32>
      %53 = vector.broadcast %3 : vector<16x1xf32> to vector<16x1024xf32>
      %54 = vector.broadcast %52 : vector<1x1024xf32> to vector<16x1024xf32>
      %55 = arith.mulf %53, %54 : vector<16x1024xf32>
      %56 = vector.broadcast %4 : vector<16x1xf32> to vector<16x1024xf32>
      %57 = arith.addf %55, %56 : vector<16x1024xf32>
      %cst_25 = arith.constant 0.000000e+00 : f32
      %58 = vector.broadcast %cst_25 : f32 to vector<16x1024xf32>
      %59 = arith.maximumf %57, %58 : vector<16x1024xf32>
      %60 = arith.addf %41, %59 : vector<16x1024xf32>
      %c2_i32 = arith.constant 2 : i32
      %cst_26 = arith.constant dense<0.000000e+00> : vector<16xf32>
      %61 = vector.multi_reduction <add>, %60, %cst_26 [1] : vector<16x1024xf32> to vector<16xf32>
      %62 = vector.shape_cast %61 : vector<16xf32> to vector<16x1xf32>
      %63 = arith.addf %20, %62 : vector<16x1xf32>
      %c0_27 = arith.constant 0 : index
      %c0_28 = arith.constant 0 : index
      %64 = vector.load %arg6[%c0_27, %c0_28] : memref<16x1xf32, #tpu.memory_space<vmem>>, vector<16x1xf32>
      tpu.vector_store %arg6[%c0_27, %c0_28], %63 {strides = array<i32>} : memref<16x1xf32, #tpu.memory_space<vmem>>, vector<16x1xf32>,
    } else {
    }
    %c0_i32_9 = arith.constant 0 : i32
    %17 = arith.cmpi eq, %arg1, %c0_i32_9 : i32
    %18 = arith.extui %17 : i1 to i32
    %c0_i32_10 = arith.constant 0 : i32
    %19 = arith.cmpi ne, %18, %c0_i32_10 : i32
    scf.if %19 {
      %c0_11 = arith.constant 0 : index
      %c0_12 = arith.constant 0 : index
      %20 = vector.load %arg6[%c0_11, %c0_12] : memref<16x1xf32, #tpu.memory_space<vmem>>, vector<16x1xf32>
      %c0_13 = arith.constant 0 : index
      %c0_14 = arith.constant 0 : index
      %c0_15 = arith.constant 0 : index
      %21 = vector.load %arg5[%c0_13, %c0_14, %c0_15] : memref<1x16x1xf32, #tpu.memory_space<vmem>>, vector<1x16x1xf32>
      %22 = vector.shape_cast %21 : vector<1x16x1xf32> to vector<16x1xf32>
      %23 = vector.shape_cast %20 : vector<16x1xf32> to vector<1x16x1xf32>
      tpu.vector_store %arg5[%c0_13, %c0_14, %c0_15], %23 {strides = array<i32>} : memref<1x16x1xf32, #tpu.memory_space<vmem>>, vector<1x16x1xf32>,
    } else {
    }
    return
  }
  func.func @transform_0(%arg0: i32, %arg1: i32) -> (i32, i32) {
    %c1_i32 = arith.constant 1 : i32
    %0 = arith.muli %arg0, %c1_i32 : i32
    %1 = arith.addi %0, %arg1 : i32
    %c0_i32 = arith.constant 0 : i32
    %2 = arith.minsi %1, %c0_i32 : i32
    %c0_i32_0 = arith.constant 0 : i32
    %c0_i32_1 = arith.constant 0 : i32
    return %c0_i32_0, %2 : i32, i32
  }
  func.func @transform_1(%arg0: i32, %arg1: i32) -> (i32, i32) {
    %c0_i32 = arith.constant 0 : i32
    %c0_i32_0 = arith.constant 0 : i32
    %c0_i32_1 = arith.constant 0 : i32
    return %c0_i32, %c0_i32_0 : i32, i32
  }
  func.func @transform_2(%arg0: i32, %arg1: i32) -> (i32, i32) {
    %c0_i32 = arith.constant 0 : i32
    %c0_i32_0 = arith.constant 0 : i32
    %c0_i32_1 = arith.constant 0 : i32
    return %c0_i32, %c0_i32_0 : i32, i32
  }
  func.func @transform_3(%arg0: i32, %arg1: i32) -> (i32, i32, i32) {
    %c0_i32 = arith.constant 0 : i32
    %c0_i32_0 = arith.constant 0 : i32
    %c0_i32_1 = arith.constant 0 : i32
    return %arg0, %c0_i32, %c0_i32_0 : i32, i32, i32
  }
}

</mosaic_0001>

<bundles_post_ra>
// kernel: tpu_custom_call.1
= control target key start
LH: loop header
LB: loop body
LE: loop exit
PB: predicated region body
PF: predicated region fallthrough
CT: control target
= control target key end

     0   :  { %v569_v0 = vmov 0   ;;  %vm47_vm0 = vcmask 7168   ;;  %s705_s2 = inlined_call_operand.vmem [shape: f32[16,1], index: 2, kind: input, shape index: {}]   ;;  %s706_s1 = inlined_call_operand.vmem [shape: f32[16,1], index: 1, kind: input, shape index: {}]   ;;  %s707_s0 = inlined_call_operand.vmem [shape: f32[1,2048], index: 0, kind: input, shape index: {}]   ;;  %s708_s3 = inlined_call_operand.vmem [shape: f32[1,16,1], index: 3, kind: output, shape index: {}]  }
   0x1   :  { %568 = vset.pattern.permute.xlu1 %v569_v0  ;;  %567 = vset.pattern.permute.xlu0 %v569_v0  ;;  %v52_v1 = vld [vmem:[%s705_s2] sm:$0xff]  ;;  %v53_v3 = vld [vmem:[%s705_s2 + $0x8] sm:$0xff] }
   0x2   :  { %v50_v2 = vld [vmem:[%s706_s1] sm:$0xff]  ;;  %113 = vperm.xlu1 %568, %v52_v1   ;;  %v51_v4 = vld [vmem:[%s706_s1 + $0x8] sm:$0xff] }
   0x3   :  { %70 = vperm.xlu0 %567, %v50_v2   ;;  %v606_v5 = vld [vmem:[%s707_s0] sm:$0xff]  ;;  %v616_v11 = vld [vmem:[%s707_s0 + $0x8] sm:$0xff] }
   0x4   :  { %v79_v6 = vperm.slane %v606_v5, 0  ;;  %v80_v7 = vperm.slane %v606_v5, 1  ;;  %v81_v8 = vperm.slane %v606_v5, 2  ;;  %v82_v9 = vperm.slane %v606_v5, 3 }
   0x5   :  { %v83_v10 = vperm.slane %v606_v5, 4  ;;  %v84_v13 = vperm.slane %v606_v5, 5  ;;  %v85_v14 = vperm.slane %v606_v5, 6  ;;  %v86_v15 = vperm.slane %v606_v5, 7 }
   0x6   :  { %v172_v22 = vperm.slane %v616_v11, 0  ;;  %v173_v23 = vperm.slane %v616_v11, 1  ;;  %v174_v26 = vperm.slane %v616_v11, 2  ;;  %v175_v27 = vperm.slane %v616_v11, 3 }
   0x7   :  { %v176_v28 = vperm.slane %v616_v11, 4  ;;  %v177_v29 = vperm.slane %v616_v11, 5  ;;  %v178_v30 = vperm.slane %v616_v11, 6  ;;  %v179_v31 = vperm.slane %v616_v11, 7 }
   0xa   :  { %118 = vperm.xlu1 %568, %v53_v3  }
   0xb   :  { %75 = vperm.xlu0 %567, %v51_v4  }
  0x74   :  { %v114_v19 = vpop.permute.xlu1 %113 }
  0x75   :  { %v71_v12 = vpop.permute.xlu0 %70 }
  0x76   :  { %v95_v16 = vmul.f32 %v79_v6, %v71_v12  ;;  %v96_v17 = vmul.f32 %v80_v7, %v71_v12  ;;  %v97_v18 = vmul.f32 %v81_v8, %v71_v12  ;;  %v98_v20 = vmul.f32 %v82_v9, %v71_v12 }
  0x77   :  { %v99_v21 = vmul.f32 %v83_v10, %v71_v12  ;;  %v100_v32 = vmul.f32 %v84_v13, %v71_v12  ;;  %v101_v33 = vmul.f32 %v85_v14, %v71_v12  ;;  %v102_v34 = vmul.f32 %v86_v15, %v71_v12 }
  0x78   :  { %v121_v24 = vadd.f32 %v114_v19, %v95_v16  ;;  %v122_v25 = vadd.f32 %v114_v19, %v96_v17  ;;  %v123_v35 = vadd.f32 %v114_v19, %v97_v18  ;;  %v124_v36 = vadd.f32 %v114_v19, %v98_v20 }
  0x79   :  { %v125_v37 = vadd.f32 %v114_v19, %v99_v21  ;;  %v188_v40 = vmul.f32 %v172_v22, %v71_v12  ;;  %v189_v41 = vmul.f32 %v173_v23, %v71_v12  ;;  %v190_v42 = vmul.f32 %v174_v26, %v71_v12 }
  0x7a   :  { %v137_v38 = vmax.f32 %v121_v24, 0.0  ;;  %v138_v39 = vmax.f32 %v122_v25, 0.0  ;;  %v191_v43 = vmul.f32 %v175_v27, %v71_v12  ;;  %v192_v44 = vmul.f32 %v176_v28, %v71_v12 }
  0x7b   :  { %v193_v45 = vmul.f32 %v177_v29, %v71_v12  ;;  %v194_v46 = vmul.f32 %v178_v30, %v71_v12  ;;  %v195_v47 = vmul.f32 %v179_v31, %v71_v12  ;;  %v204_v48 = vadd.f32 %v188_v40, %v114_v19 }
  0x7c   :  { %v205_v49 = vadd.f32 %v189_v41, %v114_v19  ;;  %v206_v50 = vadd.f32 %v190_v42, %v114_v19  ;;  %v207_v51 = vadd.f32 %v191_v43, %v114_v19  ;;  %v126_v52 = vadd.f32 %v114_v19, %v100_v32 }
  0x7d   :  { %v127_v53 = vadd.f32 %v114_v19, %v101_v33  ;;  %v139_v54 = vmax.f32 %v123_v35, 0.0  ;;  %v208_v55 = vadd.f32 %v192_v44, %v114_v19  ;;  %v209_v56 = vadd.f32 %v193_v45, %v114_v19  ;;  %v76_v63 = vpop.permute.xlu0 %75 }
  0x7e   :  { %v220_v57 = vmax.f32 %v204_v48, 0.0  ;;  %v221_v58 = vmax.f32 %v205_v49, 0.0  ;;  %v222_v59 = vmax.f32 %v206_v50, 0.0  ;;  %v128_v60 = vadd.f32 %v114_v19, %v102_v34 }
  0x7f   :  { %v210_v61 = vadd.f32 %v194_v46, %v114_v19  ;;  %v211_v62 = vadd.f32 %v195_v47, %v114_v19  ;;  %v140_v0 = vmax.f32 %v124_v36, 0.0  ;;  %v223_v1 = vmax.f32 %v207_v51, 0.0 }
  0x80   :  { %v236_v2 = vadd.f32 %v220_v57, %v137_v38  ;;  %v237_v3 = vadd.f32 %v221_v58, %v138_v39  ;;  %v141_v4 = vmax.f32 %v125_v37, 0.0  ;;  %v142_v12 = vmax.f32 %v126_v52, 0.0  ;;  %v119_v38 = vpop.permute.xlu1 %118 }
  0x81   :  { %v224_v16 = vmax.f32 %v208_v55, 0.0  ;;  %v143_v17 = vmax.f32 %v127_v53, 0.0  ;;  %v225_v18 = vmax.f32 %v209_v56, 0.0  ;;  %v238_v20 = vadd.f32 %v222_v59, %v139_v54 }
  0x82   :  { %v252_v21 = vadd.f32 %v237_v3, %v236_v2  ;;  %v144_v24 = vmax.f32 %v128_v60, 0.0  ;;  %v226_v25 = vmax.f32 %v210_v61, 0.0  ;;  %v227_v32 = vmax.f32 %v211_v62, 0.0 }
  0x83   :  { %v103_v33 = vmul.f32 %v79_v6, %v76_v63  ;;  %v239_v34 = vadd.f32 %v223_v1, %v140_v0  ;;  %v104_v35 = vmul.f32 %v80_v7, %v76_v63  ;;  %v240_v36 = vadd.f32 %v224_v16, %v141_v4 }
  0x84   :  { %v253_v19 = vadd.f32 %v252_v21, %v238_v20  ;;  %v241_v37 = vadd.f32 %v225_v18, %v142_v12  ;;  %v105_v40 = vmul.f32 %v81_v8, %v76_v63  ;;  %v106_v41 = vmul.f32 %v82_v9, %v76_v63 }
  0x85   :  { %v242_v42 = vadd.f32 %v226_v25, %v143_v17  ;;  %v243_v43 = vadd.f32 %v227_v32, %v144_v24  ;;  %v107_v6 = vmul.f32 %v83_v10, %v76_v63  ;;  %v129_v44 = vadd.f32 %v119_v38, %v103_v33 }
  0x86   :  { %v254_v39 = vadd.f32 %v253_v19, %v239_v34  ;;  %v108_v7 = vmul.f32 %v84_v13, %v76_v63  ;;  %v109_v46 = vmul.f32 %v85_v14, %v76_v63  ;;  %v130_v47 = vadd.f32 %v119_v38, %v104_v35 }
  0x87   :  { %v196_v8 = vmul.f32 %v172_v22, %v76_v63  ;;  %v197_v9 = vmul.f32 %v173_v23, %v76_v63  ;;  %v198_v48 = vmul.f32 %v174_v26, %v76_v63  ;;  %v199_v10 = vmul.f32 %v175_v27, %v76_v63 }
  0x88   :  { %v255_v45 = vadd.f32 %v254_v39, %v240_v36  ;;  %v131_v50 = vadd.f32 %v119_v38, %v105_v40  ;;  %v132_v51 = vadd.f32 %v119_v38, %v106_v41  ;;  %v200_v13 = vmul.f32 %v176_v28, %v76_v63 }
  0x89   :  { %v145_v14 = vmax.f32 %v129_v44, 0.0  ;;  %v212_v52 = vadd.f32 %v196_v8, %v119_v38  ;;  %v213_v53 = vadd.f32 %v197_v9, %v119_v38  ;;  %v214_v54 = vadd.f32 %v198_v48, %v119_v38 }
  0x8a   :  { %v256_v49 = vadd.f32 %v255_v45, %v241_v37  ;;  %v146_v55 = vmax.f32 %v130_v47, 0.0  ;;  %v201_v23 = vmul.f32 %v177_v29, %v76_v63  ;;  %v215_v56 = vadd.f32 %v199_v10, %v119_v38 }
  0x8b   :  { %v133_v26 = vadd.f32 %v119_v38, %v107_v6  ;;  %v202_v27 = vmul.f32 %v178_v30, %v76_v63  ;;  %v228_v57 = vmax.f32 %v212_v52, 0.0  ;;  %v229_v58 = vmax.f32 %v213_v53, 0.0 }
  0x8c   :  { %v257_v22 = vadd.f32 %v256_v49, %v242_v42  ;;  %v147_v60 = vmax.f32 %v131_v50, 0.0  ;;  %v216_v61 = vadd.f32 %v200_v13, %v119_v38  ;;  %v230_v28 = vmax.f32 %v214_v54, 0.0 }
  0x8d   :  { %v110_v62 = vmul.f32 %v86_v15, %v76_v63  ;;  %v134_v0 = vadd.f32 %v119_v38, %v108_v7  ;;  %v148_v1 = vmax.f32 %v132_v51, 0.0  ;;  %v244_v2 = vadd.f32 %v228_v57, %v145_v14 }
  0x8e   :  { %v258_v59 = vadd.f32 %v257_v22, %v243_v43  ;;  %v203_v29 = vmul.f32 %v179_v31, %v76_v63  ;;  %v217_v3 = vadd.f32 %v201_v23, %v119_v38  ;;  %v231_v4 = vmax.f32 %v215_v56, 0.0 }
  0x8f   :  { %v245_v12 = vadd.f32 %v229_v58, %v146_v55  ;;  %v135_v30 = vadd.f32 %v119_v38, %v109_v46  ;;  %v149_v16 = vmax.f32 %v133_v26, 0.0  ;;  %v218_v17 = vadd.f32 %v202_v27, %v119_v38 }
  0x90   :  { %259 = vadd.xlane.f32.xlu2 %v258_v59  ;;  %v232_v18 = vmax.f32 %v216_v61, 0.0  ;;  %v246_v20 = vadd.f32 %v230_v28, %v147_v60  ;;  %v136_v24 = vadd.f32 %v119_v38, %v110_v62  ;;  %v150_v5 = vmax.f32 %v134_v0, 0.0 }
  0x91   :  { %v261_v21 = vadd.f32 %v245_v12, %v244_v2  ;;  %v570_v15 = vmov 0.0   ;;  %v219_v25 = vadd.f32 %v203_v29, %v119_v38  ;;  %v233_v32 = vmax.f32 %v217_v3, 0.0 }
  0x92   :  { %48 = vst.msk [vmem:[#allocation2] sm:$0xff] %vm47_vm0, %v570_v15  ;;  %v247_v33 = vadd.f32 %v231_v4, %v148_v1  ;;  %v151_v31 = vmax.f32 %v135_v30, 0.0  ;;  %v234_v63 = vmax.f32 %v218_v17, 0.0  ;;  %v248_v34 = vadd.f32 %v232_v18, %v149_v16 }
  0x93   :  { %v262_v11 = vadd.f32 %v261_v21, %v246_v20  ;;  %49 = vst.msk [vmem:[#allocation2 + $0x8] sm:$0xff] %vm47_vm0, %v570_v15  ;;  %v152_v35 = vmax.f32 %v136_v24, 0.0  ;;  %v235_v36 = vmax.f32 %v219_v25, 0.0  ;;  %v249_v37 = vadd.f32 %v233_v32, %v150_v5 }
  0x94   :  { %v250_v40 = vadd.f32 %v234_v63, %v151_v31 }
  0x95   :  { %v263_v19 = vadd.f32 %v262_v11, %v247_v33  ;;  %v251_v42 = vadd.f32 %v235_v36, %v152_v35 }
  0x97   :  { %v264_v39 = vadd.f32 %v263_v19, %v248_v34 }
  0x99   :  { %v265_v41 = vadd.f32 %v264_v39, %v249_v37  ;;  %v65_v38 = vld [vmem:[#allocation2] sm:$0xff] }
  0x9a   :  { %v66_v46 = vld [vmem:[#allocation2 + $0x8] sm:$0xff] }
  0x9b   :  { %v266_v43 = vadd.f32 %v265_v41, %v250_v40 }
  0x9d   :  { %v267_v6 = vadd.f32 %v266_v43, %v251_v42 }
  0x9f   :  { %268 = vadd.xlane.f32.xlu2 %v267_v6 }
 0x103   :  { %v260_v44 = vpop.xlane.xlu2 %259 }
 0x104   :  { %v270_v45 = vadd.f32 %v260_v44, %v65_v38 }
 0x106   :  { %273 = vst.msk [vmem:[#allocation2] sm:$0xff] %vm47_vm0, %v270_v45 }
 0x10d   :  { %v551_v7 = vld [vmem:[#allocation2] sm:$0xff] }
 0x10e   :  { %554 = vst.msk [vmem:[%s708_s3] sm:$0xff] %vm47_vm0, %v551_v7 }
 0x112   :  { %v269_v47 = vpop.xlane.xlu2 %268 }
 0x113   :  { %v271_v8 = vadd.f32 %v269_v47, %v66_v46 }
 0x115   :  { %274 = vst.msk [vmem:[#allocation2 + $0x8] sm:$0xff] %vm47_vm0, %v271_v8 }
 0x11c   :  { %v552_v9 = vld [vmem:[#allocation2 + $0x8] sm:$0xff] }
 0x11d   :  { %555 = vst.msk [vmem:[%s708_s3 + $0x8] sm:$0xff] %vm47_vm0, %v552_v9 }

</bundles_post_ra>
